<compile_context>
chip_gen: v6e
topology: v6e:2x2x1
jax: 0.10.0
libtpu: 0.0.40
codegen_flags: <defaults>
</compile_context>

<pallas_src>
import functools

import jax
import jax.numpy as jnp
from jax.experimental import pallas as pl
from jax.experimental.pallas import tpu as pltpu

_VMEM_LIMIT = 48 * 1024 * 1024   # headroom under v7x's 64 MiB physical VMEM
_TILE_P = 512                    # >=512 rows => near-roofline pipelining


def _round_up(x, m):
    return (x + m - 1) // m * m


# ----------------------------------------------------------------------------
# Kernel 1: conv-as-matmul (bf16 MXU, f32 accumulate) + per-tile BN partials
# ----------------------------------------------------------------------------
def _conv_stats_kernel(p_ref, w_ref, conv_ref, sum_ref, ssq_ref):
    # p_ref: [tile_p, Kpad] bf16 im2col patches
    # w_ref: [Kpad, Cpad]  bf16 conv weight
    # conv_ref: [tile_p, Cpad] f32 conv output tile
    # sum_ref/ssq_ref: [1, 1, Cpad] f32 per-tile partial BN statistics
    acc = jnp.dot(p_ref[...], w_ref[...], preferred_element_type=jnp.float32)
    conv_ref[...] = acc
    sum_ref[...] = jnp.sum(acc, axis=0, keepdims=True)[None]
    ssq_ref[...] = jnp.sum(acc * acc, axis=0, keepdims=True)[None]


def _conv_partial_stats(patches, w, tile_p):
    p_pad, k_pad = patches.shape
    c_pad = w.shape[1]
    nt = p_pad // tile_p
    return pl.pallas_call(
        _conv_stats_kernel,
        out_shape=(
            jax.ShapeDtypeStruct((p_pad, c_pad), jnp.float32),
            jax.ShapeDtypeStruct((nt, 1, c_pad), jnp.float32),
            jax.ShapeDtypeStruct((nt, 1, c_pad), jnp.float32),
        ),
        grid=(nt,),
        in_specs=[
            pl.BlockSpec((tile_p, k_pad), lambda i: (i, 0)),
            pl.BlockSpec((k_pad, c_pad), lambda i: (0, 0)),
        ],
        out_specs=(
            pl.BlockSpec((tile_p, c_pad), lambda i: (i, 0)),
            pl.BlockSpec((1, 1, c_pad), lambda i: (i, 0, 0)),
            pl.BlockSpec((1, 1, c_pad), lambda i: (i, 0, 0)),
        ),
        compiler_params=pltpu.CompilerParams(
            dimension_semantics=("parallel",),
            vmem_limit_bytes=_VMEM_LIMIT),
    )(patches, w)


# ----------------------------------------------------------------------------
# Kernel 2: BatchNorm folded to one affine (scale/shift) + LeakyReLU(0.2)
# ----------------------------------------------------------------------------
def _bn_act_kernel(conv_ref, scale_ref, shift_ref, o_ref, *, negative_slope):
    y = conv_ref[...] * scale_ref[...] + shift_ref[...]
    o_ref[...] = jnp.where(y > 0, y, y * negative_slope).astype(o_ref.dtype)


def _bn_act(conv, scale, shift, tile_p, negative_slope):
    p_pad, c_pad = conv.shape
    nt = p_pad // tile_p
    kernel = functools.partial(_bn_act_kernel, negative_slope=negative_slope)
    return pl.pallas_call(
        kernel,
        out_shape=jax.ShapeDtypeStruct((p_pad, c_pad), jnp.float32),
        grid=(nt,),
        in_specs=[
            pl.BlockSpec((tile_p, c_pad), lambda i: (i, 0)),
            pl.BlockSpec((1, c_pad), lambda i: (0, 0)),
            pl.BlockSpec((1, c_pad), lambda i: (0, 0)),
        ],
        out_specs=pl.BlockSpec((tile_p, c_pad), lambda i: (i, 0)),
        compiler_params=pltpu.CompilerParams(
            dimension_semantics=("parallel",),
            vmem_limit_bytes=_VMEM_LIMIT),
    )(conv, scale, shift)


# ----------------------------------------------------------------------------
# Model
# ----------------------------------------------------------------------------
class Downto2D128Pallas:
    """Pallas port of Downto2D128 forward (3x Block3DCNN + depth squeeze)."""

    EPS = 1e-5
    NEG_SLOPE = 0.2    # LeakyReLU(0.2)
    KSIZE = 3
    PAD = 1

    def __init__(self, in_channels=3, features=16, key=jax.random.PRNGKey(0)):
        specs = [
            (in_channels, features * 4, (2, 1, 1)),   # down1
            (features * 4, features * 4, (2, 1, 1)),  # down2
            (features * 4, features * 2, (2, 2, 2)),  # down3
        ]
        self.layers = []
        keys = jax.random.split(key, 3 * len(specs))
        k = self.KSIZE
        for li, (cin, cout, stride) in enumerate(specs):
            kw_, kg, kb = keys[3 * li], keys[3 * li + 1], keys[3 * li + 2]
            kdim = cin * k * k * k
            # nn.Conv3d weight layout [Cout, Cin, kd, kh, kw]; pre-store once as
            # a dense, padded [Kpad, Cpad] bf16 matrix (K ordered kd,kh,kw,ci).
            w = (jax.random.normal(kw_, (cout, cin, k, k, k), jnp.float32)
                 / jnp.sqrt(kdim))
            k_pad = _round_up(kdim, 128)
            c_pad = _round_up(cout, 128)
            w_kc = jnp.transpose(w, (2, 3, 4, 1, 0)).reshape(kdim, cout)
            w_kc = jnp.pad(w_kc, ((0, k_pad - kdim), (0, c_pad - cout)))
            w_kc = w_kc.astype(jnp.bfloat16)
            # BatchNorm3d affine params (deterministic, non-trivial values).
            gamma = 1.0 + 0.1 * jax.random.normal(kg, (cout,), jnp.float32)
            beta = 0.1 * jax.random.normal(kb, (cout,), jnp.float32)
            gamma = jnp.pad(gamma, (0, c_pad - cout)).reshape(1, c_pad)
            beta = jnp.pad(beta, (0, c_pad - cout)).reshape(1, c_pad)
            self.layers.append(dict(cin=cin, cout=cout, stride=stride,
                                    w=w_kc, gamma=gamma, beta=beta,
                                    K=kdim, Kpad=k_pad, Cpad=c_pad))

    def __call__(self, x):
        # x: [N, Cin, D, H, W] float32 (NCDHW, same as PyTorch).
        h = jnp.transpose(x, (0, 2, 3, 4, 1)).astype(jnp.float32)  # NDHWC
        for layer in self.layers:
            h = self._block(h, layer)
        # torch.reshape(d3, (N, C, H, W)) is only valid when Dout == 1.
        n, d, hh, ww, c = h.shape
        assert d == 1, f"depth must reduce to 1, got {d}"
        return jnp.transpose(h[:, 0], (0, 3, 1, 2))                # NCHW

    def _block(self, x, layer):
        n, din, hin, win, cin = x.shape
        sd, sh, sw = layer['stride']
        k, p = self.KSIZE, self.PAD
        do = (din + 2 * p - k) // sd + 1
        ho = (hin + 2 * p - k) // sh + 1
        wo = (win + 2 * p - k) // sw + 1

        # Reflect padding (PyTorch padding_mode='reflect').
        x_pad = jnp.pad(x, ((0, 0), (p, p), (p, p), (p, p), (0, 0)),
                        mode='reflect')

        # Channel-last im2col: 27 lane-contiguous tap slices, concatenated on
        # the channel axis (no transpose relayout).
        taps = []
        for kd in range(k):
            for kh in range(k):
                for kw in range(k):
                    taps.append(
                        x_pad[:,
                              kd:kd + sd * (do - 1) + 1:sd,
                              kh:kh + sh * (ho - 1) + 1:sh,
                              kw:kw + sw * (wo - 1) + 1:sw, :])
        pat = jnp.concatenate(taps, axis=-1)          # [N, Do, Ho, Wo, 27*Cin]

        P = n * do * ho * wo
        kdim, k_pad, c_pad = layer['K'], layer['Kpad'], layer['Cpad']
        pat = pat.reshape(P, kdim).astype(jnp.bfloat16)

        tile_p = _TILE_P if P >= _TILE_P else _round_up(P, 8)
        p_pad = _round_up(P, tile_p)
        # Zero-padded rows/cols contribute exactly 0 to the BN sums below.
        pat = jnp.pad(pat, ((0, p_pad - P), (0, k_pad - kdim)))

        # Phase 1: conv tiles + per-tile partial BN statistics.
        conv, sums, ssqs = _conv_partial_stats(pat, layer['w'], tile_p)

        # Tiny glue reduction: global (training-mode, biased) BN stats folded
        # into a single per-channel affine.
        cnt = jnp.float32(P)
        mean = jnp.sum(sums, axis=0) / cnt                        # [1, Cpad]
        ex2 = jnp.sum(ssqs, axis=0) / cnt
        var = jnp.maximum(ex2 - mean * mean, 0.0)
        scale = layer['gamma'] * jax.lax.rsqrt(var + self.EPS)
        shift = layer['beta'] - mean * scale

        # Phase 2: normalize + LeakyReLU(0.2).
        y = _bn_act(conv, scale, shift, tile_p, self.NEG_SLOPE)
        y = y[:P, :layer['cout']].reshape(n, do, ho, wo, layer['cout'])
        # TODO(synk): nn.Dropout(0.5) (training mode) intentionally omitted;
        # eval-mode dropout is the identity.
        return y


if __name__ == "__main__":
    key = jax.random.PRNGKey(0)
    kx, kp = jax.random.split(key)

    # Small shapes consistent with the module: depth 8 reduces to 1 after the
    # three stride-2 depth downsamples; H=W=16 halves once (down3).
    N, Cin, D, H, W = 2, 3, 8, 16, 16
    features = 16
    x = jax.random.normal(kx, (N, Cin, D, H, W), jnp.float32)

    model = Downto2D128Pallas(in_channels=Cin, features=features, key=kp)
    y = model(x)
    y = jax.block_until_ready(y)

    assert y.shape == (N, features * 2, H // 2, W // 2), y.shape
    assert bool(jnp.all(jnp.isfinite(y)))
    print("KERNEL_OK")
</pallas_src>

<mosaic_0001>
module attributes {stable_mosaic.version = 11 : i64} {
  func.func @_conv_stats_kernel(%arg0: i32, %arg1: memref<512x128xbf16, #tpu.memory_space<vmem>>, %arg2: memref<128x128xbf16, #tpu.memory_space<vmem>>, %arg3: memref<512x128xf32, #tpu.memory_space<vmem>>, %arg4: memref<1x1x128xf32, #tpu.memory_space<vmem>>, %arg5: memref<1x1x128xf32, #tpu.memory_space<vmem>>) attributes {dimension_semantics = [#tpu.dimension_semantics<parallel>], iteration_bounds = array<i64: 4>, scalar_prefetch = 0 : i64, scratch_operands = 0 : i64, tpu.core_type = #tpu.core_type<tc>, window_params = [{transform_indices = @transform_0, window_bounds = array<i64: 512, 128>}, {pipeline_mode = #tpu.pipeline_mode<synchronous>, transform_indices = @transform_1, window_bounds = array<i64: 128, 128>}, {transform_indices = @transform_2, window_bounds = array<i64: 512, 128>}, {transform_indices = @transform_3, window_bounds = array<i64: 1, 1, 128>}, {transform_indices = @transform_4, window_bounds = array<i64: 1, 1, 128>}]} {
    %c0 = arith.constant 0 : index
    %c0_0 = arith.constant 0 : index
    %0 = vector.load %arg1[%c0, %c0_0] : memref<512x128xbf16, #tpu.memory_space<vmem>>, vector<512x128xbf16>
    %c0_1 = arith.constant 0 : index
    %c0_2 = arith.constant 0 : index
    %1 = vector.load %arg2[%c0_1, %c0_2] : memref<128x128xbf16, #tpu.memory_space<vmem>>, vector<128x128xbf16>
    %cst = arith.constant dense<0.000000e+00> : vector<512x128xf32>
    %2 = tpu.matmul %0, %1, %cst {dimension_numbers = #tpu.dot_dimension_numbers<[1], [0], [0], [1], [0, 0, 1, 1], [], []>} : vector<512x128xbf16>, vector<128x128xbf16>, vector<512x128xf32> -> vector<512x128xf32>
    %c0_3 = arith.constant 0 : index
    %c0_4 = arith.constant 0 : index
    %3 = vector.load %arg3[%c0_3, %c0_4] : memref<512x128xf32, #tpu.memory_space<vmem>>, vector<512x128xf32>
    tpu.vector_store %arg3[%c0_3, %c0_4], %2 {strides = array<i32>} : memref<512x128xf32, #tpu.memory_space<vmem>>, vector<512x128xf32>,
    %cst_5 = arith.constant dense<0.000000e+00> : vector<128xf32>
    %4 = vector.multi_reduction <add>, %2, %cst_5 [0] : vector<512x128xf32> to vector<128xf32>
    %5 = vector.shape_cast %4 : vector<128xf32> to vector<1x128xf32>
    %6 = vector.shape_cast %5 : vector<1x128xf32> to vector<1x1x128xf32>
    %c0_6 = arith.constant 0 : index
    %c0_7 = arith.constant 0 : index
    %c0_8 = arith.constant 0 : index
    %7 = vector.load %arg4[%c0_6, %c0_7, %c0_8] : memref<1x1x128xf32, #tpu.memory_space<vmem>>, vector<1x1x128xf32>
    tpu.vector_store %arg4[%c0_6, %c0_7, %c0_8], %6 {strides = array<i32>} : memref<1x1x128xf32, #tpu.memory_space<vmem>>, vector<1x1x128xf32>,
    %8 = arith.mulf %2, %2 : vector<512x128xf32>
    %cst_9 = arith.constant dense<0.000000e+00> : vector<128xf32>
    %9 = vector.multi_reduction <add>, %8, %cst_9 [0] : vector<512x128xf32> to vector<128xf32>
    %10 = vector.shape_cast %9 : vector<128xf32> to vector<1x128xf32>
    %11 = vector.shape_cast %10 : vector<1x128xf32> to vector<1x1x128xf32>
    %c0_10 = arith.constant 0 : index
    %c0_11 = arith.constant 0 : index
    %c0_12 = arith.constant 0 : index
    %12 = vector.load %arg5[%c0_10, %c0_11, %c0_12] : memref<1x1x128xf32, #tpu.memory_space<vmem>>, vector<1x1x128xf32>
    tpu.vector_store %arg5[%c0_10, %c0_11, %c0_12], %11 {strides = array<i32>} : memref<1x1x128xf32, #tpu.memory_space<vmem>>, vector<1x1x128xf32>,
    return
  }
  func.func @transform_0(%arg0: i32) -> (i32, i32) {
    %c0_i32 = arith.constant 0 : i32
    %c0_i32_0 = arith.constant 0 : i32
    return %arg0, %c0_i32 : i32, i32
  }
  func.func @transform_1(%arg0: i32) -> (i32, i32) {
    %c0_i32 = arith.constant 0 : i32
    %c0_i32_0 = arith.constant 0 : i32
    %c0_i32_1 = arith.constant 0 : i32
    return %c0_i32, %c0_i32_0 : i32, i32
  }
  func.func @transform_2(%arg0: i32) -> (i32, i32) {
    %c0_i32 = arith.constant 0 : i32
    %c0_i32_0 = arith.constant 0 : i32
    return %arg0, %c0_i32 : i32, i32
  }
  func.func @transform_3(%arg0: i32) -> (i32, i32, i32) {
    %c0_i32 = arith.constant 0 : i32
    %c0_i32_0 = arith.constant 0 : i32
    %c0_i32_1 = arith.constant 0 : i32
    return %arg0, %c0_i32, %c0_i32_0 : i32, i32, i32
  }
  func.func @transform_4(%arg0: i32) -> (i32, i32, i32) {
    %c0_i32 = arith.constant 0 : i32
    %c0_i32_0 = arith.constant 0 : i32
    %c0_i32_1 = arith.constant 0 : i32
    return %arg0, %c0_i32, %c0_i32_0 : i32, i32, i32
  }
}

</mosaic_0001>

<bundles_post_ra>
// kernel: tpu_custom_call.1
= control target key start
LH: loop header
LB: loop body
LE: loop exit
PB: predicated region body
PF: predicated region fallthrough
CT: control target
= control target key end

     0   :  { %10 = vsyncpa [#allocation3], 0  ;;  %s2377_s0 = inlined_call_operand.hbm [shape: bf16[2048,128], index: 0, kind: input, shape index: {}]   ;;  %s2378_s1 = inlined_call_operand.hbm [shape: bf16[128,128], index: 1, kind: input, shape index: {}]   ;;  %s2379_s2 = inlined_call_operand.hbm [shape: f32[2048,128], index: 2, kind: output, shape index: {0}]   ;;  %s2380_s3 = inlined_call_operand.hbm [shape: f32[4,1,128], index: 3, kind: output, shape index: {1}]   ;;  %s2381_s4 = inlined_call_operand.hbm [shape: f32[4,1,128], index: 4, kind: output, shape index: {2}]  }
   0x1   :  { %12 = vsyncpa [#allocation3 + $0x1], 0 }
   0x2   :  { %13 = vsyncpa [#allocation6], 0 }
   0x3   :  { %14 = vsyncpa [#allocation4], 0 }
   0x4   :  { %16 = vsyncpa [#allocation4 + $0x1], 0 }
   0x5   :  { %17 = vsyncpa [#allocation9], 0 }
   0x6   :  { %19 = vsyncpa [#allocation9 + $0x1], 0  ;;  %s1832_s15 = smov 0   ;;  %s1834_s16 = smov 0  }
   0x7   :  { %s1836_s17 = smov 0   ;;  %s1838_s18 = smov 0  }
   0x8 LB: > { %s1853_s19 = sadd.s32 4294967295, %s1796_s18   ;;  %s2383_s20 = sadd.s32 4294967294, %s1796_s18   ;;  %s1796_s18 = sphi %s1838_s18, %s2404_s18   ;;  %s1792_s17 = sphi %s1836_s17, %s2403_s17   ;;  %s1788_s16 = sphi %s1834_s16, %s2402_s16   ;;  %s1784_s15 = sphi %s1832_s15, %s2401_s15  }
   0x9   : > { %p45_p0 = scmp.ne.s32.totalorder %s1788_s16, %s1784_s15  ;;  %p2382_p1 = scmp.eq.s32.totalorder %s1853_s19, 0 }
   0xa   : > { %p96_p3 = scmp.eq.s32.totalorder %s2383_s20, 3  ;;  %p1312_p5 = scmp.ge.s32.totalorder %s1796_s18, 1 }
   0xb   : > { %p1864_p4 = por %p2382_p1, %p45_p0  ;;  %p155_p7 = scmp.lt.s32.totalorder %s1796_s18, 5 }
   0xc   : > { %p1869_p6 = por %p96_p3, %p45_p0  ;;  %s1798_s24 = smov [#allocation5]  }
   0xd   : > { %s2387_s21 = scalar_select %p1864_p4, 1, 0 }
   0xe   : > { %s2388_s22 = scalar_select %p1869_p6, 1, 0 }
   0xf   : > { %p1874_p8 = pnand %p1312_p5, %p155_p7  ;;  %s167_s25 = sshll.u32 %s1798_s24, 4  ;;  %s168_s25 = int_to_ptr.vmem [resolvable:$true] %s167_s25 }
  0x10   : > { %s1887_s27 = sadd.s32 1, %s1796_s18   ;;  %s32_s28 = sadd.s32 1, %s1792_s17 }
  0x11   : > { %s2389_s23 = scalar_select %p1874_p8, 1, 0 }
  0x12   : > { %p1519_p9 = pneg %p1874_p8  ;;  %s29_s29 = ssub.s32 %s1796_s18, %s1887_s27 }
  0x13   : > { %s1629_s30 = scalar_lea.vmem %s168_s25, 1024  ;;  %p1637_p3 = scmp.lt.s32.totalorder %s168_s25, %s168_s25 }
  0x14   : > { %p1882_p10 = pnand %p1519_p9, %p2382_p1  ;;  %p1630_p12 = scmp.ne.s32.totalorder %s168_s25, %s1629_s30 }
  0x15   : > { %p1638_p5 = scmp.lt.s32.totalorder %s1629_s30, %s1629_s30 }
  0x16   : > { %p1620_p11 = pneg %p1882_p10 }
  0x17   : > { %p1639_p7 = por %p1638_p5, %p1637_p3 }
  0x18   : > { %p1632_p13 = pnand %p1630_p12, %p1620_p11 }
  0x1a   : > { %p1633_p0 = pneg %p1632_p13 }
  0x1c   : > { %p1640_p2 = pnand %p1639_p7, %p1633_p0 }
  0x1e   : > { %1643 = shalt.err (!%p1640_p2)
}
  0x1f   : > { %s1799_s5 = smov 64   ;;  %s1800_s6 = smov 4  }
  0x20   : > { %1522 = dma.hbm_to_vmem [thread:$0]  (!%p1882_p10), %s2378_s1, 1024, %s168_s25, [#allocation6], %s1799_s5, %s1799_s5, %s1800_s6  }
  0x21   : > { %p30_p2 = scmp.eq.s32.totalorder %s29_s29, 0  ;;  %p39_p9 = scmp.ne.s32.totalorder %s1792_s17, %s1788_s16 }
  0x22   : > { %p40_p11 = scmp.eq.s32.totalorder %s1796_s18, 0  ;;  %p1538_p12 = scmp.lt.s32.totalorder %s1796_s18, 4 }
  0x23   : > { %s1907_s9 = scalar_select %p30_p2, %s1792_s17, %s32_s28  }
  0x24   : > { %p41_p13 = por %p40_p11, %p39_p9  ;;  %p2391_p0 = scmp.eq.s32.totalorder %s1853_s19, 3 }
  0x25   : > { %s181_s11 = sand.u32 1, %s1792_s17   ;;  %s1369_s12 = sshll.u32 %s1796_s18, 12 }
  0x26   : > { %p1911_p3 = por %p2391_p0, %p39_p9  ;;  %s1315_s13 = sshll.u32 %s181_s11, 8 }
  0x27   : > { %s1920_s26 = scalar_lea.hbm %s2377_s0, %s1369_s12  ;;  %s185_s25 = scalar_lea.vmem [#allocation2], %s1315_s13 }
  0x28   : > { %s2392_s10 = scalar_select %p1911_p3, 1, 0 }
  0x29   : > { %s192_s28 = sshll.u32 %s185_s25, 4  ;;  %p1922_p10 = pnand %p1538_p12, %p41_p13  ;;  %s1926_s28 = int_to_ptr.vmem [resolvable:$true] %s192_s28 }
  0x2a   : > { %s1928_s30 = scalar_lea.sflag [#allocation3], %s181_s11  ;;  %s1644_s7 = scalar_lea.hbm %s1920_s26, 4096 }
  0x2b   : > { %p1645_p5 = scmp.ne.s32.totalorder %s1920_s26, %s1644_s7  ;;  %p1646_p7 = pneg %p1922_p10 }
  0x2c   : > { %s1649_s13 = scalar_lea.hbm %s2377_s0, 16384  ;;  %p1650_p11 = scmp.lt.s32.totalorder %s1920_s26, %s2377_s0 }
  0x2d   : > { %p1647_p2 = pnand %p1646_p7, %p1645_p5  ;;  %p1651_p12 = scmp.lt.s32.totalorder %s1649_s13, %s1644_s7 }
  0x2f   : > { %p1648_p9 = pneg %p1647_p2  ;;  %p1652_p13 = por %p1651_p12, %p1650_p11 }
  0x31   : > { %p1653_p0 = pnand %p1652_p13, %p1648_p9 }
  0x33   : > { %1656 = shalt.err (!%p1653_p0)
}
  0x34   : > { %s1657_s11 = scalar_lea.vmem %s1926_s28, 4096  ;;  %s1801_s25 = smov [#allocation2]  }
  0x35   : > { %p1658_p1 = scmp.ne.s32.totalorder %s1926_s28, %s1657_s11  ;;  %s1662_s20 = sshll.u32 %s1801_s25, 4  ;;  %s1663_s20 = int_to_ptr.vmem [resolvable:$false] %s1662_s20 }
  0x36   : > { %s1664_s8 = scalar_lea.vmem %s1663_s20, 8192  ;;  %p1665_p2 = scmp.lt.s32.totalorder %s1926_s28, %s1663_s20 }
  0x37   : > { %p1660_p6 = pnand %p1658_p1, %p1646_p7  ;;  %p1666_p3 = scmp.lt.s32.totalorder %s1664_s8, %s1657_s11 }
  0x39   : > { %p1661_p5 = pneg %p1660_p6  ;;  %p1667_p4 = por %p1666_p3, %p1665_p2 }
  0x3b   : > { %p1668_p8 = pnand %p1667_p4, %p1661_p5 }
  0x3d   : > { %1671 = shalt.err (!%p1668_p8)
}
  0x3e   : > { %1526 = dma.hbm_to_vmem [thread:$0]  (!%p1922_p10), %s1920_s26, 4096, %s1926_s28, %s1928_s30, %s1799_s5, %s1799_s5, %s1800_s6  }
  0x3f   : > { %p2394_p1 = scmp.ne.s32.totalorder %s2389_s23, 0 }
  0x40   : > { %s1955_s7 = sand.u32 (!%p2394_p1), 1, %s1788_s16   ;;  %p2395_p4 = scmp.ne.s32.totalorder (!%p2394_p1), %s2387_s21, 0 }
  0x41   : > { %204 = sbr.rel (%p2394_p1) target bundleno = 488 (0x1e8), region = 28  ;;  %s1319_s20 = sshll.u32 (!%p2394_p1), %s1955_s7, 8 }
  0x42   : > { %s207_s12 = scalar_lea.sflag (!%p2394_p1), [#allocation3], %s1955_s7  ;;  %s1959_s13 = scalar_lea.vmem (!%p2394_p1), [#allocation2], %s1319_s20 }
  0x46   : > { %1767 = dma.done.wait (%p2395_p4), %s207_s12, 4096  }
  0x47   : > { %1769 = vsyncadd (%p2395_p4), %s207_s12, 4294963200  ;;  %p2396_p6 = scmp.eq.s32.totalorder %s1853_s19, 0 }
  0x49   : > { %1771 = dma.done.wait (%p2396_p6), [#allocation6], 1024   ;;  %p2397_p8 = pmov %p2396_p6 }
  0x4a   : > { %v1578_v0 = vld [vmem:[#allocation5 + $0x38] sm:$0xff]   ;;  %v1579_v1 = vld [vmem:[#allocation5 + $0x30] sm:$0xff]   ;;  %v1580_v2 = vld [vmem:[#allocation5 + $0x28] sm:$0xff]   ;;  %s1321_s21 = sshll.u32 %s1955_s7, 9  ;;  %s1370_s5 = sshll.u32 %s1853_s19, 13 }
  0x4b   : > { %1773 = vsyncadd (%p2397_p8), [#allocation6], 4294966272  ;;  %1411 = vmatprep.subr.bf16.mxu0 %v1578_v0  ;;  %1491 = vmatprep.subr.bf16.mxu1 %v1578_v0  ;;  %v1581_v3 = vld [vmem:[#allocation5 + $0x20] sm:$0xff]   ;;  %v1582_v5 = vld [vmem:[#allocation5 + $0x18] sm:$0xff]   ;;  %s2004_s23 = scalar_lea.vmem [#allocation7], %s1321_s21  ;;  %s2161_s29 = scalar_lea.hbm %s2379_s2, %s1370_s5 }
  0x4c   : > { %1412 = vmatpush3.bf16.msra.mxu0 %v1578_v0  ;;  %1499 = vmatpush3.bf16.msra.mxu1 %v1578_v0  ;;  %v1586_v4 = vld [vmem:[%s1959_s13] sm:$0xff]   ;;  %v1583_v6 = vld [vmem:[#allocation5 + $0x10] sm:$0xff]   ;;  %v1584_v7 = vld [vmem:[#allocation5 + $0x8] sm:$0xff]   ;;  %s1149_s6 = sshll.u32 %s2004_s23, 4  ;;  %s1128_s30 = scalar_lea.sflag [#allocation4], %s1955_s7  ;;  %s2163_s6 = int_to_ptr.vmem [resolvable:$true] %s1149_s6 }
  0x4d   : > { %1413 = vmatprep.subr.bf16.mxu0 %v1579_v1  ;;  %1492 = vmatprep.subr.bf16.mxu1 %v1579_v1  ;;  %v1585_v8 = vld [vmem:[#allocation5] sm:$0xff]   ;;  %v1587_v10 = vld [vmem:[%s1959_s13 + $0x8] sm:$0xff]   ;;  %v1588_v11 = vld [vmem:[%s1959_s13 + $0x10] sm:$0xff]   ;;  %s1672_s14 = scalar_lea.vmem %s2163_s6, 8192  ;;  %p2398_p10 = scmp.ne.s32.totalorder %s2392_s10, 0 }
  0x4e   : > { %1427 = vmatprep.mubr.bf16.mxu0 %v1586_v4  ;;  %v1602_v9 = vld [vmem:[%s1959_s13 + $0x80] sm:$0xff]   ;;  %v1603_v12 = vld [vmem:[%s1959_s13 + $0x88] sm:$0xff]   ;;  %v1604_v13 = vld [vmem:[%s1959_s13 + $0x90] sm:$0xff]   ;;  %p1673_p3 = scmp.ne.s32.totalorder %s2163_s6, %s1672_s14  ;;  %s1802_s24 = smov [#allocation7]  }
  0x4f   : > { %1459 = vmatprep.mubr.bf16.mxu1 %v1602_v9  ;;  %v1589_v14 = vld [vmem:[%s1959_s13 + $0x18] sm:$0xff]   ;;  %v1590_v15 = vld [vmem:[%s1959_s13 + $0x20] sm:$0xff]   ;;  %v1591_v18 = vld [vmem:[%s1959_s13 + $0x28] sm:$0xff]   ;;  %s1676_s11 = sshll.u32 %s1802_s24, 4  ;;  %s1677_s11 = int_to_ptr.vmem [resolvable:$false] %s1676_s11 }
  0x50   : > { %1414 = vmatpush3.bf16.msra.mxu0 %v1579_v1  ;;  %1500 = vmatpush3.bf16.msra.mxu1 %v1579_v1  ;;  %v1605_v16 = vld [vmem:[%s1959_s13 + $0x98] sm:$0xff]   ;;  %v1606_v17 = vld [vmem:[%s1959_s13 + $0xa0] sm:$0xff]   ;;  %v1607_v19 = vld [vmem:[%s1959_s13 + $0xa8] sm:$0xff]   ;;  %p1674_p7 = pnand %p1673_p3, %p2398_p10  ;;  %s1678_s25 = scalar_lea.vmem %s1677_s11, 16384 }
  0x51   : > { %1415 = vmatprep.subr.bf16.mxu0 %v1580_v2  ;;  %1493 = vmatprep.subr.bf16.mxu1 %v1580_v2  ;;  %v1592_v20 = vld [vmem:[%s1959_s13 + $0x30] sm:$0xff]   ;;  %v1593_v22 = vld [vmem:[%s1959_s13 + $0x38] sm:$0xff]   ;;  %v1594_v24 = vld [vmem:[%s1959_s13 + $0x40] sm:$0xff]   ;;  %p1679_p11 = scmp.lt.s32.totalorder %s2163_s6, %s1677_s11  ;;  %p1680_p12 = scmp.lt.s32.totalorder %s1678_s25, %s1672_s14 }
  0x52   : > { %v1608_v21 = vld [vmem:[%s1959_s13 + $0xb0] sm:$0xff]   ;;  %v1609_v23 = vld [vmem:[%s1959_s13 + $0xb8] sm:$0xff]   ;;  %v1610_v25 = vld [vmem:[%s1959_s13 + $0xc0] sm:$0xff]   ;;  %p1675_p9 = pneg %p1674_p7 }
  0x53   : > { %v1595_v26 = vld [vmem:[%s1959_s13 + $0x48] sm:$0xff]   ;;  %v1596_v28 = vld [vmem:[%s1959_s13 + $0x50] sm:$0xff]   ;;  %v1597_v30 = vld [vmem:[%s1959_s13 + $0x58] sm:$0xff]   ;;  %p1681_p13 = por %p1680_p12, %p1679_p11 }
  0x54   : > { %1416 = vmatpush3.bf16.msra.mxu0 %v1580_v2  ;;  %1501 = vmatpush3.bf16.msra.mxu1 %v1580_v2  ;;  %v1611_v27 = vld [vmem:[%s1959_s13 + $0xc8] sm:$0xff]   ;;  %v1612_v29 = vld [vmem:[%s1959_s13 + $0xd0] sm:$0xff]   ;;  %v1613_v31 = vld [vmem:[%s1959_s13 + $0xd8] sm:$0xff]  }
  0x55   : > { %1417 = vmatprep.subr.bf16.mxu0 %v1581_v3  ;;  %1494 = vmatprep.subr.bf16.mxu1 %v1581_v3  ;;  %v1598_v32 = vld [vmem:[%s1959_s13 + $0x60] sm:$0xff]   ;;  %v1599_v34 = vld [vmem:[%s1959_s13 + $0x68] sm:$0xff]   ;;  %v1600_v36 = vld [vmem:[%s1959_s13 + $0x70] sm:$0xff]   ;;  %p1682_p0 = pnand %p1681_p13, %p1675_p9 }
  0x56   : > { %v1614_v33 = vld [vmem:[%s1959_s13 + $0xe0] sm:$0xff]   ;;  %v1615_v35 = vld [vmem:[%s1959_s13 + $0xe8] sm:$0xff]   ;;  %v1616_v37 = vld [vmem:[%s1959_s13 + $0xf0] sm:$0xff]  }
  0x57   : > { %v1601_v38 = vld [vmem:[%s1959_s13 + $0x78] sm:$0xff]  }
  0x58   : > { %1418 = vmatpush3.bf16.msra.mxu0 %v1581_v3  ;;  %1502 = vmatpush3.bf16.msra.mxu1 %v1581_v3  ;;  %v1617_v39 = vld [vmem:[%s1959_s13 + $0xf8] sm:$0xff]  }
  0x59   : > { %1419 = vmatprep.subr.bf16.mxu0 %v1582_v5  ;;  %1495 = vmatprep.subr.bf16.mxu1 %v1582_v5 }
  0x5c   : > { %1420 = vmatpush3.bf16.msra.mxu0 %v1582_v5  ;;  %1503 = vmatpush3.bf16.msra.mxu1 %v1582_v5 }
  0x5d   : > { %1421 = vmatprep.subr.bf16.mxu0 %v1583_v6  ;;  %1496 = vmatprep.subr.bf16.mxu1 %v1583_v6 }
  0x60   : > { %1422 = vmatpush3.bf16.msra.mxu0 %v1583_v6  ;;  %1504 = vmatpush3.bf16.msra.mxu1 %v1583_v6 }
  0x61   : > { %1423 = vmatprep.subr.bf16.mxu0 %v1584_v7  ;;  %1497 = vmatprep.subr.bf16.mxu1 %v1584_v7 }
  0x64   : > { %1424 = vmatpush3.bf16.msra.mxu0 %v1584_v7  ;;  %1505 = vmatpush3.bf16.msra.mxu1 %v1584_v7 }
  0x65   : > { %1425 = vmatprep.subr.bf16.mxu0 %v1585_v8  ;;  %1498 = vmatprep.subr.bf16.mxu1 %v1585_v8 }
  0x68   : > { %1426 = vmatpush3.bf16.msra.mxu0 %v1585_v8  ;;  %1506 = vmatpush3.bf16.msra.mxu1 %v1585_v8 }
  0x6b   : > { %1428 = vmatmul.mubr.bf16.vlgmr.msra.gmra.mxu0 %v1587_v10  ;;  %1460 = vmatmul.mubr.bf16.vlgmr.msra.gmra.mxu1 %v1603_v12 }
  0x6c   : > { %1431 = vmatprep.mubr.bf16.mxu0 %v1588_v11  ;;  %1463 = vmatprep.mubr.bf16.mxu1 %v1604_v13 }
  0x73   : > { %1432 = vmatmul.mubr.bf16.gmra.mxu0 %v1589_v14  ;;  %1464 = vmatmul.mubr.bf16.gmra.mxu1 %v1605_v16 }
  0x74   : > { %1435 = vmatprep.mubr.bf16.mxu0 %v1590_v15  ;;  %1467 = vmatprep.mubr.bf16.mxu1 %v1606_v17 }
  0x7b   : > { %1436 = vmatmul.mubr.bf16.gmra.mxu0 %v1591_v18  ;;  %1468 = vmatmul.mubr.bf16.gmra.mxu1 %v1607_v19 }
  0x7c   : > { %1439 = vmatprep.mubr.bf16.mxu0 %v1592_v20  ;;  %1471 = vmatprep.mubr.bf16.mxu1 %v1608_v21 }
  0x83   : > { %1440 = vmatmul.mubr.bf16.gmra.mxu0 %v1593_v22  ;;  %1472 = vmatmul.mubr.bf16.gmra.mxu1 %v1609_v23 }
  0x84   : > { %1443 = vmatprep.mubr.bf16.mxu0 %v1594_v24  ;;  %1475 = vmatprep.mubr.bf16.mxu1 %v1610_v25 }
  0x8b   : > { %1444 = vmatmul.mubr.bf16.gmra.mxu0 %v1595_v26  ;;  %1476 = vmatmul.mubr.bf16.gmra.mxu1 %v1611_v27 }
  0x8c   : > { %1447 = vmatprep.mubr.bf16.mxu0 %v1596_v28  ;;  %1479 = vmatprep.mubr.bf16.mxu1 %v1612_v29 }
  0x93   : > { %1448 = vmatmul.mubr.bf16.gmra.mxu0 %v1597_v30  ;;  %1480 = vmatmul.mubr.bf16.gmra.mxu1 %v1613_v31 }
  0x94   : > { %1451 = vmatprep.mubr.bf16.mxu0 %v1598_v32  ;;  %1483 = vmatprep.mubr.bf16.mxu1 %v1614_v33 }
  0x9b   : > { %1452 = vmatmul.mubr.bf16.gmra.mxu0 %v1599_v34  ;;  %1484 = vmatmul.mubr.bf16.gmra.mxu1 %v1615_v35 }
  0x9c   : > { %1455 = vmatprep.mubr.bf16.mxu0 %v1600_v36  ;;  %1487 = vmatprep.mubr.bf16.mxu1 %v1616_v37 }
  0xa3   : > { %1456 = vmatmul.mubr.bf16.gmra.mxu0 %v1601_v38  ;;  %1488 = vmatmul.mubr.bf16.gmra.mxu1 %v1617_v39 }
 0x12b   : > { %v1429_v40 = vpop.f32.mrf.mxu0  ;;  %v2002_v41 = vpop.f32.mrf.mxu1 }
 0x12c   : > { %861 = vst [vmem:[%s2004_s23 + $0x10] sm:$0xff] %v1429_v40  ;;  %893 = vst [vmem:[%s2004_s23 + $0x110] sm:$0xff] %v2002_v41  ;;  %v995_v53 = vmul.f32 %v1429_v40, %v1429_v40 }
 0x12d   : > { %v604_v42 = vpop.f32.mrf.mxu0  ;;  %v2009_v43 = vpop.f32.mrf.mxu1 }
 0x12e   : > { %859 = vst [vmem:[%s2004_s23] sm:$0xff] %v604_v42  ;;  %891 = vst [vmem:[%s2004_s23 + $0x100] sm:$0xff] %v2009_v43  ;;  %v993_v48 = vmul.f32 %v604_v42, %v604_v42 }
 0x12f   : > { %v1430_v44 = vpop.f32.mrf.mxu0  ;;  %v2014_v45 = vpop.f32.mrf.mxu1 }
 0x130   : > { %862 = vst [vmem:[%s2004_s23 + $0x18] sm:$0xff] %v1430_v44  ;;  %894 = vst [vmem:[%s2004_s23 + $0x118] sm:$0xff] %v2014_v45  ;;  %v996_v58 = vmul.f32 %v1430_v44, %v1430_v44 }
 0x131   : > { %v607_v46 = vpop.f32.mrf.mxu0  ;;  %v2019_v47 = vpop.f32.mrf.mxu1 }
 0x132   : > { %860 = vst [vmem:[%s2004_s23 + $0x8] sm:$0xff] %v607_v46  ;;  %v923_v49 = vadd.f32 %v607_v46, %v604_v42  ;;  %v994_v50 = vmul.f32 %v607_v46, %v607_v46  ;;  %892 = vst [vmem:[%s2004_s23 + $0x108] sm:$0xff] %v2019_v47 }
 0x133   : > { %v1433_v51 = vpop.f32.mrf.mxu0  ;;  %v2024_v52 = vpop.f32.mrf.mxu1 }
 0x134   : > { %v924_v54 = vadd.f32 %v1429_v40, %v923_v49  ;;  %v1057_v55 = vadd.f32 %v994_v50, %v993_v48  ;;  %865 = vst [vmem:[%s2004_s23 + $0x30] sm:$0xff] %v1433_v51  ;;  %897 = vst [vmem:[%s2004_s23 + $0x130] sm:$0xff] %v2024_v52  ;;  %v999_v9 = vmul.f32 %v1433_v51, %v1433_v51 }
 0x135   : > { %v620_v56 = vpop.f32.mrf.mxu0  ;;  %v2029_v57 = vpop.f32.mrf.mxu1 }
 0x136   : > { %v1058_v59 = vadd.f32 %v1057_v55, %v995_v53  ;;  %863 = vst [vmem:[%s2004_s23 + $0x20] sm:$0xff] %v620_v56  ;;  %v925_v60 = vadd.f32 %v1430_v44, %v924_v54  ;;  %895 = vst [vmem:[%s2004_s23 + $0x120] sm:$0xff] %v2029_v57  ;;  %v997_v0 = vmul.f32 %v620_v56, %v620_v56 }
 0x137   : > { %v1434_v61 = vpop.f32.mrf.mxu0  ;;  %v2034_v62 = vpop.f32.mrf.mxu1 }
 0x138   : > { %v926_v63 = vadd.f32 %v925_v60, %v620_v56  ;;  %v1059_v1 = vadd.f32 %v1058_v59, %v996_v58  ;;  %866 = vst [vmem:[%s2004_s23 + $0x38] sm:$0xff] %v1434_v61  ;;  %898 = vst [vmem:[%s2004_s23 + $0x138] sm:$0xff] %v2034_v62  ;;  %v1000_v14 = vmul.f32 %v1434_v61, %v1434_v61 }
 0x139   : > { %v623_v2 = vpop.f32.mrf.mxu0  ;;  %v2039_v3 = vpop.f32.mrf.mxu1 }
 0x13a   : > { %v1060_v4 = vadd.f32 %v1059_v1, %v997_v0  ;;  %864 = vst [vmem:[%s2004_s23 + $0x28] sm:$0xff] %v623_v2  ;;  %v927_v5 = vadd.f32 %v926_v63, %v623_v2  ;;  %v998_v6 = vmul.f32 %v623_v2, %v623_v2  ;;  %896 = vst [vmem:[%s2004_s23 + $0x128] sm:$0xff] %v2039_v3 }
 0x13b   : > { %v1437_v7 = vpop.f32.mrf.mxu0  ;;  %v2044_v8 = vpop.f32.mrf.mxu1 }
 0x13c   : > { %v928_v10 = vadd.f32 %v1433_v51, %v927_v5  ;;  %v1061_v11 = vadd.f32 %v1060_v4, %v998_v6  ;;  %869 = vst [vmem:[%s2004_s23 + $0x50] sm:$0xff] %v1437_v7  ;;  %901 = vst [vmem:[%s2004_s23 + $0x150] sm:$0xff] %v2044_v8  ;;  %v1003_v29 = vmul.f32 %v1437_v7, %v1437_v7 }
 0x13d   : > { %v636_v12 = vpop.f32.mrf.mxu0  ;;  %v2049_v13 = vpop.f32.mrf.mxu1 }
 0x13e   : > { %v1062_v15 = vadd.f32 %v1061_v11, %v999_v9  ;;  %867 = vst [vmem:[%s2004_s23 + $0x40] sm:$0xff] %v636_v12  ;;  %v929_v16 = vadd.f32 %v1434_v61, %v928_v10  ;;  %899 = vst [vmem:[%s2004_s23 + $0x140] sm:$0xff] %v2049_v13  ;;  %v1001_v20 = vmul.f32 %v636_v12, %v636_v12 }
 0x13f   : > { %v1438_v17 = vpop.f32.mrf.mxu0  ;;  %v2054_v18 = vpop.f32.mrf.mxu1 }
 0x140   : > { %v930_v19 = vadd.f32 %v929_v16, %v636_v12  ;;  %v1063_v21 = vadd.f32 %v1062_v15, %v1000_v14  ;;  %870 = vst [vmem:[%s2004_s23 + $0x58] sm:$0xff] %v1438_v17  ;;  %902 = vst [vmem:[%s2004_s23 + $0x158] sm:$0xff] %v2054_v18  ;;  %v1004_v34 = vmul.f32 %v1438_v17, %v1438_v17 }
 0x141   : > { %v639_v22 = vpop.f32.mrf.mxu0  ;;  %v2059_v23 = vpop.f32.mrf.mxu1 }
 0x142   : > { %v1064_v24 = vadd.f32 %v1063_v21, %v1001_v20  ;;  %868 = vst [vmem:[%s2004_s23 + $0x48] sm:$0xff] %v639_v22  ;;  %v931_v25 = vadd.f32 %v930_v19, %v639_v22  ;;  %v1002_v26 = vmul.f32 %v639_v22, %v639_v22  ;;  %900 = vst [vmem:[%s2004_s23 + $0x148] sm:$0xff] %v2059_v23 }
 0x143   : > { %v1441_v27 = vpop.f32.mrf.mxu0  ;;  %v2064_v28 = vpop.f32.mrf.mxu1 }
 0x144   : > { %v932_v30 = vadd.f32 %v1437_v7, %v931_v25  ;;  %v1065_v31 = vadd.f32 %v1064_v24, %v1002_v26  ;;  %873 = vst [vmem:[%s2004_s23 + $0x70] sm:$0xff] %v1441_v27  ;;  %905 = vst [vmem:[%s2004_s23 + $0x170] sm:$0xff] %v2064_v28  ;;  %v1007_v54 = vmul.f32 %v1441_v27, %v1441_v27 }
 0x145   : > { %v652_v32 = vpop.f32.mrf.mxu0  ;;  %v2069_v33 = vpop.f32.mrf.mxu1 }
 0x146   : > { %v1066_v35 = vadd.f32 %v1065_v31, %v1003_v29  ;;  %871 = vst [vmem:[%s2004_s23 + $0x60] sm:$0xff] %v652_v32  ;;  %v933_v36 = vadd.f32 %v1438_v17, %v932_v30  ;;  %903 = vst [vmem:[%s2004_s23 + $0x160] sm:$0xff] %v2069_v33  ;;  %v1005_v40 = vmul.f32 %v652_v32, %v652_v32 }
 0x147   : > { %v1442_v37 = vpop.f32.mrf.mxu0  ;;  %v2074_v38 = vpop.f32.mrf.mxu1 }
 0x148   : > { %v934_v39 = vadd.f32 %v933_v36, %v652_v32  ;;  %v1067_v42 = vadd.f32 %v1066_v35, %v1004_v34  ;;  %874 = vst [vmem:[%s2004_s23 + $0x78] sm:$0xff] %v1442_v37  ;;  %906 = vst [vmem:[%s2004_s23 + $0x178] sm:$0xff] %v2074_v38  ;;  %v1008_v60 = vmul.f32 %v1442_v37, %v1442_v37 }
 0x149   : > { %v655_v44 = vpop.f32.mrf.mxu0  ;;  %v2079_v46 = vpop.f32.mrf.mxu1 }
 0x14a   : > { %v1068_v48 = vadd.f32 %v1067_v42, %v1005_v40  ;;  %872 = vst [vmem:[%s2004_s23 + $0x68] sm:$0xff] %v655_v44  ;;  %v935_v49 = vadd.f32 %v934_v39, %v655_v44  ;;  %v1006_v50 = vmul.f32 %v655_v44, %v655_v44  ;;  %904 = vst [vmem:[%s2004_s23 + $0x168] sm:$0xff] %v2079_v46 }
 0x14b   : > { %v1445_v51 = vpop.f32.mrf.mxu0  ;;  %v2084_v53 = vpop.f32.mrf.mxu1 }
 0x14c   : > { %v936_v55 = vadd.f32 %v1441_v27, %v935_v49  ;;  %v1069_v56 = vadd.f32 %v1068_v48, %v1006_v50  ;;  %877 = vst [vmem:[%s2004_s23 + $0x90] sm:$0xff] %v1445_v51  ;;  %909 = vst [vmem:[%s2004_s23 + $0x190] sm:$0xff] %v2084_v53  ;;  %v1011_v15 = vmul.f32 %v1445_v51, %v1445_v51 }
 0x14d   : > { %v668_v58 = vpop.f32.mrf.mxu0  ;;  %v2089_v59 = vpop.f32.mrf.mxu1 }
 0x14e   : > { %v1070_v61 = vadd.f32 %v1069_v56, %v1007_v54  ;;  %875 = vst [vmem:[%s2004_s23 + $0x80] sm:$0xff] %v668_v58  ;;  %v937_v63 = vadd.f32 %v1442_v37, %v936_v55  ;;  %907 = vst [vmem:[%s2004_s23 + $0x180] sm:$0xff] %v2089_v59  ;;  %v1009_v4 = vmul.f32 %v668_v58, %v668_v58 }
 0x14f   : > { %v1446_v0 = vpop.f32.mrf.mxu0  ;;  %v2094_v1 = vpop.f32.mrf.mxu1 }
 0x150   : > { %v938_v2 = vadd.f32 %v937_v63, %v668_v58  ;;  %v1071_v5 = vadd.f32 %v1070_v61, %v1008_v60  ;;  %878 = vst [vmem:[%s2004_s23 + $0x98] sm:$0xff] %v1446_v0  ;;  %910 = vst [vmem:[%s2004_s23 + $0x198] sm:$0xff] %v2094_v1  ;;  %v1012_v21 = vmul.f32 %v1446_v0, %v1446_v0 }
 0x151   : > { %v671_v6 = vpop.f32.mrf.mxu0  ;;  %v2099_v7 = vpop.f32.mrf.mxu1 }
 0x152   : > { %v1072_v9 = vadd.f32 %v1071_v5, %v1009_v4  ;;  %876 = vst [vmem:[%s2004_s23 + $0x88] sm:$0xff] %v671_v6  ;;  %v939_v10 = vadd.f32 %v938_v2, %v671_v6  ;;  %v1010_v11 = vmul.f32 %v671_v6, %v671_v6  ;;  %908 = vst [vmem:[%s2004_s23 + $0x188] sm:$0xff] %v2099_v7 }
 0x153   : > { %v1449_v12 = vpop.f32.mrf.mxu0  ;;  %v2104_v14 = vpop.f32.mrf.mxu1 }
 0x154   : > { %v940_v16 = vadd.f32 %v1445_v51, %v939_v10  ;;  %v1073_v17 = vadd.f32 %v1072_v9, %v1010_v11  ;;  %881 = vst [vmem:[%s2004_s23 + $0xb0] sm:$0xff] %v1449_v12  ;;  %913 = vst [vmem:[%s2004_s23 + $0x1b0] sm:$0xff] %v2104_v14  ;;  %v1015_v40 = vmul.f32 %v1449_v12, %v1449_v12 }
 0x155   : > { %v684_v19 = vpop.f32.mrf.mxu0  ;;  %v2109_v20 = vpop.f32.mrf.mxu1 }
 0x156   : > { %v1074_v22 = vadd.f32 %v1073_v17, %v1011_v15  ;;  %879 = vst [vmem:[%s2004_s23 + $0xa0] sm:$0xff] %v684_v19  ;;  %v941_v24 = vadd.f32 %v1446_v0, %v940_v16  ;;  %911 = vst [vmem:[%s2004_s23 + $0x1a0] sm:$0xff] %v2109_v20  ;;  %v1013_v29 = vmul.f32 %v684_v19, %v684_v19 }
 0x157   : > { %v1450_v25 = vpop.f32.mrf.mxu0  ;;  %v2114_v26 = vpop.f32.mrf.mxu1 }
 0x158   : > { %v942_v27 = vadd.f32 %v941_v24, %v684_v19  ;;  %v1075_v30 = vadd.f32 %v1074_v22, %v1012_v21  ;;  %882 = vst [vmem:[%s2004_s23 + $0xb8] sm:$0xff] %v1450_v25  ;;  %914 = vst [vmem:[%s2004_s23 + $0x1b8] sm:$0xff] %v2114_v26  ;;  %v1016_v50 = vmul.f32 %v1450_v25, %v1450_v25 }
 0x159   : > { %v687_v31 = vpop.f32.mrf.mxu0  ;;  %v2119_v32 = vpop.f32.mrf.mxu1 }
 0x15a   : > { %v1076_v34 = vadd.f32 %v1075_v30, %v1013_v29  ;;  %880 = vst [vmem:[%s2004_s23 + $0xa8] sm:$0xff] %v687_v31  ;;  %v943_v35 = vadd.f32 %v942_v27, %v687_v31  ;;  %v1014_v36 = vmul.f32 %v687_v31, %v687_v31  ;;  %912 = vst [vmem:[%s2004_s23 + $0x1a8] sm:$0xff] %v2119_v32 }
 0x15b   : > { %v1453_v37 = vpop.f32.mrf.mxu0  ;;  %v2124_v39 = vpop.f32.mrf.mxu1 }
 0x15c   : > { %v944_v42 = vadd.f32 %v1449_v12, %v943_v35  ;;  %v1077_v44 = vadd.f32 %v1076_v34, %v1014_v36  ;;  %885 = vst [vmem:[%s2004_s23 + $0xd0] sm:$0xff] %v1453_v37  ;;  %917 = vst [vmem:[%s2004_s23 + $0x1d0] sm:$0xff] %v2124_v39  ;;  %v1019_v10 = vmul.f32 %v1453_v37, %v1453_v37 }
 0x15d   : > { %v700_v48 = vpop.f32.mrf.mxu0  ;;  %v2129_v49 = vpop.f32.mrf.mxu1 }
 0x15e   : > { %v1078_v51 = vadd.f32 %v1077_v44, %v1015_v40  ;;  %883 = vst [vmem:[%s2004_s23 + $0xc0] sm:$0xff] %v700_v48  ;;  %v945_v54 = vadd.f32 %v1450_v25, %v944_v42  ;;  %915 = vst [vmem:[%s2004_s23 + $0x1c0] sm:$0xff] %v2129_v49  ;;  %v1017_v60 = vmul.f32 %v700_v48, %v700_v48 }
 0x15f   : > { %v1454_v55 = vpop.f32.mrf.mxu0  ;;  %v2134_v56 = vpop.f32.mrf.mxu1 }
 0x160   : > { %v946_v58 = vadd.f32 %v945_v54, %v700_v48  ;;  %v1079_v61 = vadd.f32 %v1078_v51, %v1016_v50  ;;  %886 = vst [vmem:[%s2004_s23 + $0xd8] sm:$0xff] %v1454_v55  ;;  %918 = vst [vmem:[%s2004_s23 + $0x1d8] sm:$0xff] %v2134_v56  ;;  %v1020_v17 = vmul.f32 %v1454_v55, %v1454_v55 }
 0x161   : > { %v703_v63 = vpop.f32.mrf.mxu0  ;;  %v2139_v0 = vpop.f32.mrf.mxu1 }
 0x162   : > { %v1080_v2 = vadd.f32 %v1079_v61, %v1017_v60  ;;  %884 = vst [vmem:[%s2004_s23 + $0xc8] sm:$0xff] %v703_v63  ;;  %v947_v4 = vadd.f32 %v946_v58, %v703_v63  ;;  %v1018_v5 = vmul.f32 %v703_v63, %v703_v63  ;;  %916 = vst [vmem:[%s2004_s23 + $0x1c8] sm:$0xff] %v2139_v0 }
 0x163   : > { %v1457_v6 = vpop.f32.mrf.mxu0  ;;  %v2144_v9 = vpop.f32.mrf.mxu1 }
 0x164   : > { %v948_v11 = vadd.f32 %v1453_v37, %v947_v4  ;;  %v1081_v12 = vadd.f32 %v1080_v2, %v1018_v5  ;;  %889 = vst [vmem:[%s2004_s23 + $0xf0] sm:$0xff] %v1457_v6  ;;  %921 = vst [vmem:[%s2004_s23 + $0x1f0] sm:$0xff] %v2144_v9 }
 0x165   : > { %v716_v15 = vpop.f32.mrf.mxu0  ;;  %v2151_v16 = vpop.f32.mrf.mxu1 }
 0x166   : > { %v1082_v19 = vadd.f32 %v1081_v12, %v1019_v10  ;;  %887 = vst [vmem:[%s2004_s23 + $0xe0] sm:$0xff] %v716_v15  ;;  %v949_v21 = vadd.f32 %v1454_v55, %v948_v11  ;;  %919 = vst [vmem:[%s2004_s23 + $0x1e0] sm:$0xff] %v2151_v16  ;;  %v1021_v27 = vmul.f32 %v716_v15, %v716_v15 }
 0x167   : > { %v1458_v22 = vpop.f32.mrf.mxu0  ;;  %v2156_v24 = vpop.f32.mrf.mxu1 }
 0x168   : > { %v950_v25 = vadd.f32 %v949_v21, %v716_v15  ;;  %v1083_v29 = vadd.f32 %v1082_v19, %v1020_v17  ;;  %890 = vst [vmem:[%s2004_s23 + $0xf8] sm:$0xff] %v1458_v22  ;;  %922 = vst [vmem:[%s2004_s23 + $0x1f8] sm:$0xff] %v2156_v24 }
 0x169   : > { %v719_v30 = vpop.f32.mrf.mxu0  ;;  %v2168_v31 = vpop.f32.mrf.mxu1 }
 0x16a   : > { %v1084_v34 = vadd.f32 %v1083_v29, %v1021_v27  ;;  %888 = vst [vmem:[%s2004_s23 + $0xe8] sm:$0xff] %v719_v30  ;;  %v951_v35 = vadd.f32 %v950_v25, %v719_v30  ;;  %v1022_v36 = vmul.f32 %v719_v30, %v719_v30  ;;  %920 = vst [vmem:[%s2004_s23 + $0x1e8] sm:$0xff] %v2168_v31 }
 0x16b   : > { %1685 = shalt.err (!%p1682_p0)
}
 0x16c   : > { %s1686_s8 = scalar_lea.hbm %s2161_s29, 8192  ;;  %s1690_s13 = scalar_lea.hbm %s2379_s2, 32768 }
 0x16d   : > { %p1687_p5 = scmp.ne.s32.totalorder %s2161_s29, %s1686_s8  ;;  %p1691_p4 = scmp.lt.s32.totalorder %s2161_s29, %s2379_s2 }
 0x16e   : > { %p1692_p6 = scmp.lt.s32.totalorder %s1690_s13, %s1686_s8 }
 0x16f   : > { %p1688_p2 = pnand %p1687_p5, %p2398_p10 }
 0x170   : > { %p1693_p8 = por %p1692_p6, %p1691_p4 }
 0x171   : > { %p1689_p1 = pneg %p1688_p2 }
 0x173   : > { %p1694_p3 = pnand %p1693_p8, %p1689_p1 }
 0x175   : > { %1697 = shalt.err (!%p1694_p3)
}
 0x176   : > { %s1803_s5 = smov 128   ;;  %s1804_s26 = smov 8   ;;  %v1023_v37 = vmul.f32 %v1457_v6, %v1457_v6  ;;  %v952_v40 = vadd.f32 %v1457_v6, %v951_v35  ;;  %v1085_v42 = vadd.f32 %v1084_v34, %v1022_v36  ;;  %v1024_v44 = vmul.f32 %v1458_v22, %v1458_v22 }
 0x177   : > { %1513 = dma.vmem_to_hbm [thread:$0]  (%p2398_p10), %s2163_s6, 8192, %s2161_s29, %s1128_s30, %s1803_s5, %s1803_s5, %s1804_s26   ;;  %v1025_v51 = vmul.f32 %v2009_v43, %v2009_v43  ;;  %v1026_v60 = vmul.f32 %v2019_v47, %v2019_v47  ;;  %v1027_v63 = vmul.f32 %v2002_v41, %v2002_v41  ;;  %v1028_v5 = vmul.f32 %v2014_v45, %v2014_v45 }
 0x178   : > { %v953_v48 = vadd.f32 %v1458_v22, %v952_v40  ;;  %v1086_v50 = vadd.f32 %v1085_v42, %v1023_v37  ;;  %v1029_v11 = vmul.f32 %v2029_v57, %v2029_v57  ;;  %v1030_v17 = vmul.f32 %v2039_v3, %v2039_v3  ;;  %s1132_s6 = sand.u32 1, %s1853_s19   ;;  %s1365_s28 = sshll.u32 %s1853_s19, 4 }
 0x179   : > { %v1033_v27 = vmul.f32 %v2049_v13, %v2049_v13  ;;  %v1034_v34 = vmul.f32 %v2059_v23, %v2059_v23  ;;  %v1037_v42 = vmul.f32 %v2069_v33, %v2069_v33  ;;  %s240_s29 = scalar_lea.vmem [#allocation8], %s1955_s7  ;;  %s246_s14 = scalar_lea.vmem [#allocation10], %s1955_s7 }
 0x17a   : > { %v1087_v54 = vadd.f32 %v1086_v50, %v1024_v44  ;;  %v954_v55 = vadd.f32 %v953_v48, %v2009_v43  ;;  %v1038_v50 = vmul.f32 %v2079_v46, %v2079_v46  ;;  %s1165_s30 = sshll.u32 %s240_s29, 4  ;;  %s1178_s24 = sshll.u32 %s246_s14, 4  ;;  %s2303_s30 = int_to_ptr.vmem [resolvable:$true] %s1165_s30  ;;  %s2310_s24 = int_to_ptr.vmem [resolvable:$true] %s1178_s24 }
 0x17b   : > { %s2301_s8 = scalar_lea.hbm %s2380_s3, %s1365_s28  ;;  %s2308_s12 = scalar_lea.hbm %s2381_s4, %s1365_s28 }
 0x17c   : > { %v955_v58 = vadd.f32 %v954_v55, %v2019_v47  ;;  %v1088_v61 = vadd.f32 %v1087_v54, %v1025_v51  ;;  %s2312_s13 = scalar_lea.sflag [#allocation9], %s1132_s6  ;;  %s1698_s21 = scalar_lea.vmem %s2303_s30, 16 }
 0x17d   : > { %p1699_p7 = scmp.ne.s32.totalorder %s2303_s30, %s1698_s21  ;;  %s1805_s23 = smov [#allocation8]  }
 0x17e   : > { %v956_v2 = vadd.f32 %v2002_v41, %v955_v58  ;;  %v1089_v4 = vadd.f32 %v1088_v61, %v1026_v60  ;;  %v1031_v41 = vmul.f32 %v2024_v52, %v2024_v52  ;;  %v1041_v60 = vmul.f32 %v2089_v59, %v2089_v59  ;;  %s1702_s5 = sshll.u32 %s1805_s23, 4  ;;  %s1703_s5 = int_to_ptr.vmem [resolvable:$false] %s1702_s5 }
 0x17f   : > { %p1700_p9 = pnand %p1699_p7, %p2398_p10  ;;  %s1704_s26 = scalar_lea.vmem %s1703_s5, 32 }
 0x180   : > { %v1090_v6 = vadd.f32 %v1089_v4, %v1027_v63  ;;  %v957_v10 = vadd.f32 %v2014_v45, %v956_v2  ;;  %v1032_v45 = vmul.f32 %v2034_v62, %v2034_v62  ;;  %v1042_v2 = vmul.f32 %v2099_v7, %v2099_v7  ;;  %p1705_p12 = scmp.lt.s32.totalorder %s2303_s30, %s1703_s5  ;;  %p1706_p13 = scmp.lt.s32.totalorder %s1704_s26, %s1698_s21 }
 0x181   : > { %p1701_p11 = pneg %p1700_p9 }
 0x182   : > { %v958_v43 = vadd.f32 %v957_v10, %v2029_v57  ;;  %v1091_v12 = vadd.f32 %v1090_v6, %v1028_v5  ;;  %p1707_p0 = por %p1706_p13, %p1705_p12 }
 0x184   : > { %v1092_v47 = vadd.f32 %v1091_v12, %v1029_v11  ;;  %v959_v15 = vadd.f32 %v958_v43, %v2039_v3  ;;  %v1045_v43 = vmul.f32 %v2109_v20, %v2109_v20  ;;  %p1708_p5 = pnand %p1707_p0, %p1701_p11 }
 0x186   : > { %v960_v19 = vadd.f32 %v2024_v52, %v959_v15  ;;  %v1093_v21 = vadd.f32 %v1092_v47, %v1030_v17  ;;  %v1035_v52 = vmul.f32 %v2044_v8, %v2044_v8  ;;  %v1046_v47 = vmul.f32 %v2119_v32, %v2119_v32 }
 0x188   : > { %v1094_v22 = vadd.f32 %v1093_v21, %v1031_v41  ;;  %v961_v25 = vadd.f32 %v2034_v62, %v960_v19  ;;  %v1036_v62 = vmul.f32 %v2054_v18, %v2054_v18  ;;  %v1049_v21 = vmul.f32 %v2129_v49, %v2129_v49 }
 0x18a   : > { %v962_v57 = vadd.f32 %v961_v25, %v2049_v13  ;;  %v1095_v29 = vadd.f32 %v1094_v22, %v1032_v45  ;;  %v1050_v25 = vmul.f32 %v2139_v0, %v2139_v0 }
 0x18c   : > { %v1096_v30 = vadd.f32 %v1095_v29, %v1033_v27  ;;  %v963_v3 = vadd.f32 %v962_v57, %v2059_v23 }
 0x18e   : > { %v964_v35 = vadd.f32 %v2044_v8, %v963_v3  ;;  %v1097_v36 = vadd.f32 %v1096_v30, %v1034_v34  ;;  %v1039_v8 = vmul.f32 %v2064_v28, %v2064_v28  ;;  %v1053_v3 = vmul.f32 %v2151_v16, %v2151_v16 }
 0x190   : > { %v1098_v37 = vadd.f32 %v1097_v36, %v1035_v52  ;;  %v965_v40 = vadd.f32 %v2054_v18, %v964_v35  ;;  %v1040_v18 = vmul.f32 %v2074_v38, %v2074_v38  ;;  %v1055_v35 = vmul.f32 %v2144_v9, %v2144_v9 }
 0x192   : > { %v966_v13 = vadd.f32 %v965_v40, %v2069_v33  ;;  %v1099_v44 = vadd.f32 %v1098_v37, %v1036_v62  ;;  %v1056_v62 = vmul.f32 %v2156_v24, %v2156_v24 }
 0x194   : > { %v1100_v48 = vadd.f32 %v1099_v44, %v1037_v42  ;;  %v967_v23 = vadd.f32 %v966_v13, %v2079_v46 }
 0x196   : > { %v968_v51 = vadd.f32 %v2064_v28, %v967_v23  ;;  %v1101_v54 = vadd.f32 %v1100_v48, %v1038_v50  ;;  %v1043_v28 = vmul.f32 %v2084_v53, %v2084_v53 }
 0x198   : > { %v1102_v55 = vadd.f32 %v1101_v54, %v1039_v8  ;;  %v969_v58 = vadd.f32 %v2074_v38, %v968_v51  ;;  %v1044_v38 = vmul.f32 %v2094_v1, %v2094_v1 }
 0x19a   : > { %v970_v33 = vadd.f32 %v969_v58, %v2089_v59  ;;  %v1103_v61 = vadd.f32 %v1102_v55, %v1040_v18 }
 0x19c   : > { %v1104_v63 = vadd.f32 %v1103_v61, %v1041_v60  ;;  %v971_v46 = vadd.f32 %v970_v33, %v2099_v7 }
 0x19e   : > { %v972_v4 = vadd.f32 %v2084_v53, %v971_v46  ;;  %v1105_v5 = vadd.f32 %v1104_v63, %v1042_v2  ;;  %v1047_v53 = vmul.f32 %v2104_v14, %v2104_v14 }
 0x1a0   : > { %v1106_v6 = vadd.f32 %v1105_v5, %v1043_v28  ;;  %v973_v10 = vadd.f32 %v2094_v1, %v972_v4  ;;  %v1048_v1 = vmul.f32 %v2114_v26, %v2114_v26 }
 0x1a2   : > { %v974_v59 = vadd.f32 %v973_v10, %v2109_v20  ;;  %v1107_v11 = vadd.f32 %v1106_v6, %v1044_v38 }
 0x1a4   : > { %v1108_v12 = vadd.f32 %v1107_v11, %v1045_v43  ;;  %v975_v7 = vadd.f32 %v974_v59, %v2119_v32 }
 0x1a6   : > { %v976_v15 = vadd.f32 %v2104_v14, %v975_v7  ;;  %v1109_v17 = vadd.f32 %v1108_v12, %v1046_v47  ;;  %v1051_v14 = vmul.f32 %v2124_v39, %v2124_v39 }
 0x1a8   : > { %v1110_v41 = vadd.f32 %v1109_v17, %v1047_v53  ;;  %v977_v19 = vadd.f32 %v2114_v26, %v976_v15  ;;  %v1052_v26 = vmul.f32 %v2134_v56, %v2134_v56 }
 0x1aa   : > { %v978_v20 = vadd.f32 %v977_v19, %v2129_v49  ;;  %v1111_v45 = vadd.f32 %v1110_v41, %v1048_v1 }
 0x1ac   : > { %v1112_v22 = vadd.f32 %v1111_v45, %v1049_v21  ;;  %v979_v32 = vadd.f32 %v978_v20, %v2139_v0 }
 0x1ae   : > { %v980_v57 = vadd.f32 %v2124_v39, %v979_v32  ;;  %v1113_v27 = vadd.f32 %v1112_v22, %v1050_v25  ;;  %v1054_v39 = vmul.f32 %v2168_v31, %v2168_v31 }
 0x1b0   : > { %v1114_v29 = vadd.f32 %v1113_v27, %v1051_v14  ;;  %v981_v30 = vadd.f32 %v2134_v56, %v980_v57 }
 0x1b2   : > { %v982_v49 = vadd.f32 %v981_v30, %v2151_v16  ;;  %v1115_v34 = vadd.f32 %v1114_v29, %v1052_v26 }
 0x1b4   : > { %v1116_v52 = vadd.f32 %v1115_v34, %v1053_v3  ;;  %v983_v0 = vadd.f32 %v982_v49, %v2168_v31 }
 0x1b6   : > { %v984_v56 = vadd.f32 %v2144_v9, %v983_v0  ;;  %v1117_v36 = vadd.f32 %v1116_v52, %v1054_v39 }
 0x1b8   : > { %v985_v16 = vadd.f32 %v2156_v24, %v984_v56  ;;  %v1118_v37 = vadd.f32 %v1117_v36, %v1055_v35 }
 0x1ba   : > { %v986_v40 = vrot.slane %v985_v16, 4  ;;  %v1119_v13 = vadd.f32 %v1118_v37, %v1056_v62 }
 0x1bc   : > { %v987_v42 = vadd.f32 %v986_v40, %v985_v16  ;;  %v1120_v31 = vrot.slane %v1119_v13, 4 }
 0x1be   : > { %v988_v44 = vrot.slane %v987_v42, 2  ;;  %v1121_v48 = vadd.f32 %v1120_v31, %v1119_v13 }
 0x1c0   : > { %v989_v23 = vadd.f32 %v988_v44, %v987_v42  ;;  %v1122_v50 = vrot.slane %v1121_v48, 2 }
 0x1c2   : > { %v990_v9 = vrot.slane %v989_v23, 1  ;;  %v1123_v8 = vadd.f32 %v1122_v50, %v1121_v48 }
 0x1c4   : > { %v1124_v24 = vrot.slane %v1123_v8, 1  ;;  %v991_v51 = vadd.f32 %v990_v9, %v989_v23 }
 0x1c6   : > { %992 = vst [vmem:[%s240_s29] sm:$0x1] %v991_v51  ;;  %v1125_v54 = vadd.f32 %v1124_v24, %v1123_v8 }
 0x1c7   : > { %1711 = shalt.err (!%p1708_p5)
}
 0x1c8   : > { %s1712_s6 = scalar_lea.hbm %s2301_s8, 16  ;;  %s1716_s11 = scalar_lea.hbm %s2380_s3, 64 }
 0x1c9   : > { %p1713_p2 = scmp.ne.s32.totalorder %s2301_s8, %s1712_s6  ;;  %p1717_p6 = scmp.lt.s32.totalorder %s2301_s8, %s2380_s3 }
 0x1ca   : > { %p1718_p8 = scmp.lt.s32.totalorder %s1716_s11, %s1712_s6 }
 0x1cb   : > { %p1714_p1 = pnand %p1713_p2, %p2398_p10 }
 0x1cc   : > { %p1719_p3 = por %p1718_p8, %p1717_p6 }
 0x1cd   : > { %p1715_p4 = pneg %p1714_p1 }
 0x1cf   : > { %p1720_p7 = pnand %p1719_p3, %p1715_p4 }
 0x1d1   : > { %1723 = shalt.err (!%p1720_p7)
}
 0x1d2   : > { %1514 = dma.vmem_to_hbm [thread:$0]  (%p2398_p10), %s2303_s30, 16, %s2301_s8, %s2312_s13   ;;  %1126 = vst [vmem:[%s246_s14] sm:$0x1] %v1125_v54 }
 0x1d3   : > { %s1724_s20 = scalar_lea.vmem %s2310_s24, 16  ;;  %s1806_s21 = smov [#allocation10]  }
 0x1d4   : > { %p1725_p9 = scmp.ne.s32.totalorder %s2310_s24, %s1724_s20  ;;  %s1728_s23 = sshll.u32 %s1806_s21, 4  ;;  %s1729_s23 = int_to_ptr.vmem [resolvable:$false] %s1728_s23 }
 0x1d5   : > { %s1730_s5 = scalar_lea.vmem %s1729_s23, 32  ;;  %p1731_p13 = scmp.lt.s32.totalorder %s2310_s24, %s1729_s23 }
 0x1d6   : > { %p1726_p11 = pnand %p1725_p9, %p2398_p10  ;;  %p1732_p0 = scmp.lt.s32.totalorder %s1730_s5, %s1724_s20 }
 0x1d8   : > { %p1727_p12 = pneg %p1726_p11  ;;  %p1733_p5 = por %p1732_p0, %p1731_p13 }
 0x1da   : > { %p1734_p2 = pnand %p1733_p5, %p1727_p12 }
 0x1dc   : > { %1737 = shalt.err (!%p1734_p2)
}
 0x1dd   : > { %s1738_s7 = scalar_lea.hbm %s2308_s12, 16  ;;  %s1742_s8 = scalar_lea.hbm %s2381_s4, 64 }
 0x1de   : > { %p1739_p1 = scmp.ne.s32.totalorder %s2308_s12, %s1738_s7  ;;  %p1743_p8 = scmp.lt.s32.totalorder %s2308_s12, %s2381_s4 }
 0x1df   : > { %p1744_p3 = scmp.lt.s32.totalorder %s1742_s8, %s1738_s7 }
 0x1e0   : > { %p1740_p4 = pnand %p1739_p1, %p2398_p10 }
 0x1e1   : > { %p1745_p7 = por %p1744_p3, %p1743_p8 }
 0x1e2   : > { %p1741_p6 = pneg %p1740_p4 }
 0x1e4   : > { %p1746_p9 = pnand %p1745_p7, %p1741_p6 }
 0x1e6   : > { %1749 = shalt.err (!%p1746_p9)
}
 0x1e7   : > { %1515 = dma.vmem_to_hbm [thread:$0]  (%p2398_p10), %s2310_s24, 16, %s2308_s12, %s2312_s13  }
 0x1e8 PF: > { %p1540_p11 = scmp.ge.s32.totalorder %s1796_s18, 2  ;;  %s1190_s28 = sand.u32 1, %s1784_s15  }
 0x1e9   : > { %p2399_p12 = scmp.ne.s32.totalorder %s2388_s22, 0  ;;  %s1191_s29 = scalar_lea.sflag [#allocation4], %s1190_s28 }
 0x1eb   : > { %p1528_p13 = pnand %p1540_p11, %p2399_p12 }
 0x1ed   : > { %p1529_p0 = pneg %p1528_p13 }
 0x1ef   : > { %1775 = dma.done.wait (%p1529_p0), %s1191_s29, 8192  }
 0x1f0   : > { %1777 = vsyncadd (%p1529_p0), %s1191_s29, 4294959104  ;;  %s2400_s11 = sadd.s32 4294967294, %s1796_s18  }
 0x1f1   : > { %s1199_s25 = sand.u32 1, %s2400_s11  }
 0x1f2   : > { %s1200_s10 = scalar_lea.sflag [#allocation9], %s1199_s25 }
 0x1f3   : > { %1779 = dma.done.wait (%p1529_p0), %s1200_s10, 32  }
 0x1f4   : > { %1781 = vsyncadd (%p1529_p0), %s1200_s10, 4294967264  ;;  %p22_p10 = scmp.ge.s32.totalorder %s1887_s27, 6   ;;  %s2401_s15 = smov %s1788_s16 }
 0x1f5   : > { %s2402_s16 = smov %s1792_s17  ;;  %s2403_s17 = smov %s1907_s9 }
 0x1f6   : > { %s2404_s18 = smov %s1887_s27  ;;  %24 = sbr.rel (!%p22_p10) target bundleno = 8 (0x8), region = 109 }
 0x1fb   :  { %1212 = vsyncpa [#allocation3], 1 }
 0x1fc   :  { %1214 = vsyncpa [#allocation3 + $0x1], 1 }
 0x1fd   :  { %1215 = vsyncpa [#allocation6], 1 }
 0x1fe   :  { %1216 = vsyncpa [#allocation4], 1 }
 0x1ff   :  { %1218 = vsyncpa [#allocation4 + $0x1], 1 }
 0x200   :  { %1219 = vsyncpa [#allocation9], 1 }
 0x201   :  { %1221 = vsyncpa [#allocation9 + $0x1], 1 }

</bundles_post_ra>
